<compile_context>
chip_gen: v6e
topology: v6e:2x2x1
jax: 0.10.0
libtpu: 0.0.40
codegen_flags: <defaults>
</compile_context>

<pallas_src>
import math
import numpy as np
import jax
import jax.numpy as jnp
from jax.experimental import pallas as pl
from jax.experimental.pallas import tpu as pltpu


# --------------------------------------------------------------------- host constants
def _pos_embedding_np(length, d_model):
    position = np.arange(length, dtype=np.float32)[:, None]
    div_term = np.exp(np.arange(0, d_model, 2, dtype=np.float32)
                      * -(math.log(10000.0) / d_model))
    pe = np.zeros((length, d_model), np.float32)
    pe[:, 0::2] = np.sin(position * div_term)
    pe[:, 1::2] = np.cos(position * div_term)
    return pe


def _moving_avg_matrix(L, k):
    """(L, L) operator for AvgPool1d(kernel=k, stride=1) over a replicate-padded series.
    NOTE: assumes odd k (matches the PyTorch series_decomp with pad=(k-1)//2)."""
    pad = (k - 1) // 2
    A = np.zeros((L, L), np.float32)
    for t in range(L):
        for d in range(k):
            s = min(max(t + d - pad, 0), L - 1)
            A[t, s] += 1.0 / k
    return A


def _dec_tap_matrices(dec_T, label_len, pred_len, k_ma):
    """Per-batch (pred_len, dec_T) operators M_k so that (M_k @ x_dec) gives tap k of
    the circular Conv1d input (series_decomp -> slice last label_len -> zero-pad
    pred_len), restricted to the last pred_len output rows."""
    T2 = label_len + pred_len
    i_minus_ma = np.eye(dec_T, dtype=np.float32) - _moving_avg_matrix(dec_T, k_ma)
    G = np.zeros((T2, dec_T), np.float32)            # slice last label_len, zero-pad
    for s in range(label_len):
        G[s, dec_T - label_len + s] = 1.0
    base = G @ i_minus_ma                            # (T2, dec_T)
    mats = []
    for tap in range(3):                             # tap k reads index (t + k - 1) mod T2
        sel = np.zeros((T2, T2), np.float32)
        for t in range(T2):
            sel[t, (t + tap - 1) % T2] = 1.0
        mats.append((sel @ base)[label_len:, :])     # (pred_len, dec_T)
    return mats


# ------------------------------------------------------------------------- the kernel
def _fused_kernel(xe_ref, xd_ref, a_t_ref, m_stack_ref, w0_ref, w1_ref, w2_ref,
                  pos_ref, ln_g_ref, ln_b_ref, projw_ref, projb_ref,
                  rvg_ref, rvb_ref, tw1_ref, tb1_ref, tw2_ref, tb2_ref,
                  tw3_ref, tb3_ref, out_ref):
    f32 = jnp.float32
    xe = xe_ref[0].astype(f32)                       # (C, L)   x_enc, time on lanes
    xd = xd_ref[0].astype(f32)                       # (Td, C)  x_dec, channel last

    # ---- series decomposition of x_enc: shared (L, L) moving-average operator
    trend = jnp.dot(xe, a_t_ref[...], preferred_element_type=f32)          # (C, L)
    seasonal_enc = xe - trend

    # ---- mean_t |seasonal_enc| per channel (lane reduction, no matmul)
    num = jnp.mean(jnp.abs(seasonal_enc), axis=-1, keepdims=True)          # (C, 1)

    # ---- decoder seasonal embedding: ONE fused tap matmul + conv channel mixing
    p = pos_ref.shape[0]
    taps = jnp.dot(m_stack_ref[...], xd, preferred_element_type=f32)       # (3P, C)
    emb = (jnp.dot(taps[0:p], w0_ref[...], preferred_element_type=f32)
           + jnp.dot(taps[p:2 * p], w1_ref[...], preferred_element_type=f32)
           + jnp.dot(taps[2 * p:3 * p], w2_ref[...], preferred_element_type=f32)
           + pos_ref[...])                                                 # (P, D)

    # ---- decoder LayerNorm(d_model) + Linear(d_model -> c_out), transposed result
    mu_e = jnp.mean(emb, axis=-1, keepdims=True)
    var_e = jnp.mean((emb - mu_e) ** 2, axis=-1, keepdims=True)
    xn = (emb - mu_e) * jax.lax.rsqrt(var_e + 1e-5) * ln_g_ref[...] + ln_b_ref[...]
    seasonal_out = jax.lax.dot_general(                                    # (c_out, P)
        projw_ref[...], xn, (((1,), (1,)), ((), ())),
        preferred_element_type=f32) + projb_ref[...]
    den = jnp.mean(jnp.abs(seasonal_out), axis=-1, keepdims=True)          # (c_out, 1)
    ratio = num / den              # faithful to PyTorch: no epsilon in the ratio

    # ---- RevIN(norm) on trend (per-channel stats over time, two-pass variance)
    mu = jnp.mean(trend, axis=-1, keepdims=True)                           # (C, 1)
    var = jnp.mean((trend - mu) ** 2, axis=-1, keepdims=True)
    std = jnp.sqrt(var + 1e-5)
    g = rvg_ref[...]
    be = rvb_ref[...]
    xt = (trend - mu) / std * g + be                                       # (C, L)

    # ---- trend MLP over the time axis (shared weights, right-multiplication)
    h = jnp.maximum(jnp.dot(xt, tw1_ref[...], preferred_element_type=f32)
                    + tb1_ref[...], 0.0)                                   # (C, D)
    h = jnp.maximum(jnp.dot(h, tw2_ref[...], preferred_element_type=f32)
                    + tb2_ref[...], 0.0)                                   # (C, D)
    y = jnp.dot(h, tw3_ref[...], preferred_element_type=f32) + tb3_ref[...]  # (C, P)

    # ---- RevIN(denorm): (x - beta)/(gamma + eps^2) * stdev + mean
    trend_out = (y - be) / (g + 1e-10) * std + mu                          # (C, P)

    out_ref[0] = (trend_out + ratio * seasonal_out).astype(out_ref.dtype)


# --------------------------------------------------------------------------- wrapper
def dctformer_forward(params, cfg, tau, delta, x_enc, x_mark_enc, x_dec, x_mark_dec):
    del tau, delta, x_mark_enc, x_mark_dec          # consumed only by omitted blocks
    B, L, C = x_enc.shape
    Td = x_dec.shape[1]
    label_len, P, D = cfg["label_len"], cfg["pred_len"], cfg["d_model"]
    k_ma = cfg["moving_avg"]
    c_out = params["proj_w"].shape[0]

    # shared constant operators (static shapes -> numpy, folded at trace time)
    a_t = jnp.asarray(_moving_avg_matrix(L, k_ma).T)                       # (L, L)
    m_stack = jnp.asarray(np.concatenate(
        _dec_tap_matrices(Td, label_len, P, k_ma), axis=0))                # (3P, Td)
    pos_last = jnp.asarray(
        _pos_embedding_np(label_len + P, D)[label_len:, :])                # (P, D)

    # parameters rearranged for the per-batch layouts (constant-folded under jit)
    w0 = params["dec_conv_w"][:, :, 0].T                                   # (C, D)
    w1 = params["dec_conv_w"][:, :, 1].T
    w2 = params["dec_conv_w"][:, :, 2].T
    ln_g = params["dec_ln_g"].reshape(1, D)
    ln_b = params["dec_ln_b"].reshape(1, D)
    projw = params["proj_w"]                                               # (c_out, D)
    projb = params["proj_b"].reshape(c_out, 1)
    rvg = params["revin_g"].reshape(C, 1)
    rvb = params["revin_b"].reshape(C, 1)
    tw1 = params["t_w1"].T                                                 # (L, D)
    tb1 = params["t_b1"].reshape(1, D)
    tw2 = params["t_w2"].T                                                 # (D, D)
    tb2 = params["t_b2"].reshape(1, D)
    tw3 = params["t_w3"].T                                                 # (D, P)
    tb3 = params["t_b3"].reshape(1, P)

    xe_t = jnp.transpose(x_enc, (0, 2, 1))                                 # (B, C, L)

    consts = (a_t, m_stack, w0, w1, w2, pos_last, ln_g, ln_b, projw, projb,
              rvg, rvb, tw1, tb1, tw2, tb2, tw3, tb3)

    def _cidx(b):
        return (0, 0)

    in_specs = ([pl.BlockSpec((1, C, L), lambda b: (b, 0, 0)),
                 pl.BlockSpec((1, Td, C), lambda b: (b, 0, 0))]
                + [pl.BlockSpec(c.shape, _cidx) for c in consts])

    out_t = pl.pallas_call(
        _fused_kernel,
        grid=(B,),
        in_specs=in_specs,
        out_specs=pl.BlockSpec((1, c_out, P), lambda b: (b, 0, 0)),
        out_shape=jax.ShapeDtypeStruct((B, c_out, P), x_enc.dtype),
        compiler_params=pltpu.CompilerParams(
            dimension_semantics=("parallel",)),
    )(xe_t, x_dec, *consts)

    return jnp.transpose(out_t, (0, 2, 1))                                 # (B, P, c_out)


# ------------------------------------------------------------------------------- main
if __name__ == "__main__":
    cfg = dict(seq_len=16, label_len=8, pred_len=8, enc_in=4, c_out=4,
               d_model=32, moving_avg=5)
    B = 2
    L, P, C, D = cfg["seq_len"], cfg["pred_len"], cfg["enc_in"], cfg["d_model"]
    dec_T = cfg["label_len"] + cfg["pred_len"]

    key = jax.random.PRNGKey(0)
    ks = jax.random.split(key, 12)
    s = 0.1
    params = {
        "dec_conv_w": s * jax.random.normal(ks[1], (D, C, 3), jnp.float32),
        "dec_ln_g": jnp.ones((D,), jnp.float32),
        "dec_ln_b": jnp.zeros((D,), jnp.float32),
        "proj_w": s * jax.random.normal(ks[2], (cfg["c_out"], D), jnp.float32),
        "proj_b": s * jax.random.normal(ks[3], (cfg["c_out"],), jnp.float32),
        "revin_g": jnp.ones((C,), jnp.float32),
        "revin_b": jnp.zeros((C,), jnp.float32),
        "t_w1": s * jax.random.normal(ks[4], (D, L), jnp.float32),
        "t_b1": s * jax.random.normal(ks[5], (D,), jnp.float32),
        "t_w2": s * jax.random.normal(ks[6], (D, D), jnp.float32),
        "t_b2": s * jax.random.normal(ks[7], (D,), jnp.float32),
        "t_w3": s * jax.random.normal(ks[8], (P, D), jnp.float32),
        "t_b3": s * jax.random.normal(ks[9], (P,), jnp.float32),
    }

    x_enc = jax.random.normal(ks[10], (B, L, C), jnp.float32)
    x_dec = jax.random.normal(ks[11], (B, dec_T, C), jnp.float32)
    x_mark_enc = jnp.zeros((B, L, 4), jnp.float32)
    x_mark_dec = jnp.zeros((B, dec_T, 4), jnp.float32)
    tau = jnp.ones((B, 1), jnp.float32)
    delta = jnp.zeros((B, L), jnp.float32)

    fwd = jax.jit(lambda t, d, xe, me, xd, md: dctformer_forward(
        params, cfg, t, d, xe, me, xd, md))
    out = fwd(tau, delta, x_enc, x_mark_enc, x_dec, x_mark_dec)
    jax.block_until_ready(out)
    assert out.shape == (B, P, cfg["c_out"]), out.shape
    assert bool(jnp.all(jnp.isfinite(out)))
    print("KERNEL_OK")
</pallas_src>

<mosaic_0001>
module attributes {stable_mosaic.version = 11 : i64} {
  func.func @_fused_kernel(%arg0: i32, %arg1: memref<1x4x16xf32, #tpu.memory_space<vmem>>, %arg2: memref<1x16x4xf32, #tpu.memory_space<vmem>>, %arg3: memref<16x16xf32, #tpu.memory_space<vmem>>, %arg4: memref<24x16xf32, #tpu.memory_space<vmem>>, %arg5: memref<4x32xf32, #tpu.memory_space<vmem>>, %arg6: memref<4x32xf32, #tpu.memory_space<vmem>>, %arg7: memref<4x32xf32, #tpu.memory_space<vmem>>, %arg8: memref<8x32xf32, #tpu.memory_space<vmem>>, %arg9: memref<1x32xf32, #tpu.memory_space<vmem>>, %arg10: memref<1x32xf32, #tpu.memory_space<vmem>>, %arg11: memref<4x32xf32, #tpu.memory_space<vmem>>, %arg12: memref<4x1xf32, #tpu.memory_space<vmem>>, %arg13: memref<4x1xf32, #tpu.memory_space<vmem>>, %arg14: memref<4x1xf32, #tpu.memory_space<vmem>>, %arg15: memref<16x32xf32, #tpu.memory_space<vmem>>, %arg16: memref<1x32xf32, #tpu.memory_space<vmem>>, %arg17: memref<32x32xf32, #tpu.memory_space<vmem>>, %arg18: memref<1x32xf32, #tpu.memory_space<vmem>>, %arg19: memref<32x8xf32, #tpu.memory_space<vmem>>, %arg20: memref<1x8xf32, #tpu.memory_space<vmem>>, %arg21: memref<1x4x8xf32, #tpu.memory_space<vmem>>) attributes {dimension_semantics = [#tpu.dimension_semantics<parallel>], iteration_bounds = array<i64: 2>, scalar_prefetch = 0 : i64, scratch_operands = 0 : i64, tpu.core_type = #tpu.core_type<tc>, window_params = [{transform_indices = @transform_0, window_bounds = array<i64: 1, 4, 16>}, {transform_indices = @transform_1, window_bounds = array<i64: 1, 16, 4>}, {pipeline_mode = #tpu.pipeline_mode<synchronous>, transform_indices = @transform_2, window_bounds = array<i64: 16, 16>}, {pipeline_mode = #tpu.pipeline_mode<synchronous>, transform_indices = @transform_3, window_bounds = array<i64: 24, 16>}, {pipeline_mode = #tpu.pipeline_mode<synchronous>, transform_indices = @transform_4, window_bounds = array<i64: 4, 32>}, {pipeline_mode = #tpu.pipeline_mode<synchronous>, transform_indices = @transform_5, window_bounds = array<i64: 4, 32>}, {pipeline_mode = #tpu.pipeline_mode<synchronous>, transform_indices = @transform_6, window_bounds = array<i64: 4, 32>}, {pipeline_mode = #tpu.pipeline_mode<synchronous>, transform_indices = @transform_7, window_bounds = array<i64: 8, 32>}, {pipeline_mode = #tpu.pipeline_mode<synchronous>, transform_indices = @transform_8, window_bounds = array<i64: 1, 32>}, {pipeline_mode = #tpu.pipeline_mode<synchronous>, transform_indices = @transform_9, window_bounds = array<i64: 1, 32>}, {pipeline_mode = #tpu.pipeline_mode<synchronous>, transform_indices = @transform_10, window_bounds = array<i64: 4, 32>}, {pipeline_mode = #tpu.pipeline_mode<synchronous>, transform_indices = @transform_11, window_bounds = array<i64: 4, 1>}, {pipeline_mode = #tpu.pipeline_mode<synchronous>, transform_indices = @transform_12, window_bounds = array<i64: 4, 1>}, {pipeline_mode = #tpu.pipeline_mode<synchronous>, transform_indices = @transform_13, window_bounds = array<i64: 4, 1>}, {pipeline_mode = #tpu.pipeline_mode<synchronous>, transform_indices = @transform_14, window_bounds = array<i64: 16, 32>}, {pipeline_mode = #tpu.pipeline_mode<synchronous>, transform_indices = @transform_15, window_bounds = array<i64: 1, 32>}, {pipeline_mode = #tpu.pipeline_mode<synchronous>, transform_indices = @transform_16, window_bounds = array<i64: 32, 32>}, {pipeline_mode = #tpu.pipeline_mode<synchronous>, transform_indices = @transform_17, window_bounds = array<i64: 1, 32>}, {pipeline_mode = #tpu.pipeline_mode<synchronous>, transform_indices = @transform_18, window_bounds = array<i64: 32, 8>}, {pipeline_mode = #tpu.pipeline_mode<synchronous>, transform_indices = @transform_19, window_bounds = array<i64: 1, 8>}, {transform_indices = @transform_20, window_bounds = array<i64: 1, 4, 8>}]} {
    %c0 = arith.constant 0 : index
    %c0_0 = arith.constant 0 : index
    %c0_1 = arith.constant 0 : index
    %0 = vector.load %arg1[%c0, %c0_0, %c0_1] : memref<1x4x16xf32, #tpu.memory_space<vmem>>, vector<1x4x16xf32>
    %1 = vector.shape_cast %0 : vector<1x4x16xf32> to vector<4x16xf32>
    %c0_2 = arith.constant 0 : index
    %c0_3 = arith.constant 0 : index
    %c0_4 = arith.constant 0 : index
    %2 = vector.load %arg2[%c0_2, %c0_3, %c0_4] : memref<1x16x4xf32, #tpu.memory_space<vmem>>, vector<1x16x4xf32>
    %3 = vector.shape_cast %2 : vector<1x16x4xf32> to vector<16x4xf32>
    %c0_5 = arith.constant 0 : index
    %c0_6 = arith.constant 0 : index
    %4 = vector.load %arg3[%c0_5, %c0_6] : memref<16x16xf32, #tpu.memory_space<vmem>>, vector<16x16xf32>
    %cst = arith.constant dense<0.000000e+00> : vector<4x16xf32>
    %5 = tpu.matmul %1, %4, %cst {dimension_numbers = #tpu.dot_dimension_numbers<[1], [0], [0], [1], [0, 0, 1, 1], [], []>} : vector<4x16xf32>, vector<16x16xf32>, vector<4x16xf32> -> vector<4x16xf32>
    %6 = arith.subf %1, %5 : vector<4x16xf32>
    %7 = math.absf %6 : vector<4x16xf32>
    %cst_7 = arith.constant dense<0.000000e+00> : vector<4xf32>
    %8 = vector.multi_reduction <add>, %7, %cst_7 [1] : vector<4x16xf32> to vector<4xf32>
    %9 = vector.shape_cast %8 : vector<4xf32> to vector<4x1xf32>
    %cst_8 = arith.constant 1.600000e+01 : f32
    %10 = vector.broadcast %cst_8 : f32 to vector<4x1xf32>
    %11 = arith.divf %9, %10 : vector<4x1xf32>
    %c0_9 = arith.constant 0 : index
    %c0_10 = arith.constant 0 : index
    %12 = vector.load %arg4[%c0_9, %c0_10] : memref<24x16xf32, #tpu.memory_space<vmem>>, vector<24x16xf32>
    %cst_11 = arith.constant dense<0.000000e+00> : vector<24x4xf32>
    %13 = tpu.matmul %12, %3, %cst_11 {dimension_numbers = #tpu.dot_dimension_numbers<[1], [0], [0], [1], [0, 0, 1, 1], [], []>} : vector<24x16xf32>, vector<16x4xf32>, vector<24x4xf32> -> vector<24x4xf32>
    %14 = vector.extract_strided_slice %13 {offsets = [0, 0], sizes = [8, 4], strides = [1, 1]} : vector<24x4xf32> to vector<8x4xf32>
    %c0_12 = arith.constant 0 : index
    %c0_13 = arith.constant 0 : index
    %15 = vector.load %arg5[%c0_12, %c0_13] : memref<4x32xf32, #tpu.memory_space<vmem>>, vector<4x32xf32>
    %cst_14 = arith.constant dense<0.000000e+00> : vector<8x32xf32>
    %16 = tpu.matmul %14, %15, %cst_14 {dimension_numbers = #tpu.dot_dimension_numbers<[1], [0], [0], [1], [0, 0, 1, 1], [], []>} : vector<8x4xf32>, vector<4x32xf32>, vector<8x32xf32> -> vector<8x32xf32>
    %17 = vector.extract_strided_slice %13 {offsets = [8, 0], sizes = [8, 4], strides = [1, 1]} : vector<24x4xf32> to vector<8x4xf32>
    %c0_15 = arith.constant 0 : index
    %c0_16 = arith.constant 0 : index
    %18 = vector.load %arg6[%c0_15, %c0_16] : memref<4x32xf32, #tpu.memory_space<vmem>>, vector<4x32xf32>
    %cst_17 = arith.constant dense<0.000000e+00> : vector<8x32xf32>
    %19 = tpu.matmul %17, %18, %cst_17 {dimension_numbers = #tpu.dot_dimension_numbers<[1], [0], [0], [1], [0, 0, 1, 1], [], []>} : vector<8x4xf32>, vector<4x32xf32>, vector<8x32xf32> -> vector<8x32xf32>
    %20 = arith.addf %16, %19 : vector<8x32xf32>
    %21 = vector.extract_strided_slice %13 {offsets = [16, 0], sizes = [8, 4], strides = [1, 1]} : vector<24x4xf32> to vector<8x4xf32>
    %c0_18 = arith.constant 0 : index
    %c0_19 = arith.constant 0 : index
    %22 = vector.load %arg7[%c0_18, %c0_19] : memref<4x32xf32, #tpu.memory_space<vmem>>, vector<4x32xf32>
    %cst_20 = arith.constant dense<0.000000e+00> : vector<8x32xf32>
    %23 = tpu.matmul %21, %22, %cst_20 {dimension_numbers = #tpu.dot_dimension_numbers<[1], [0], [0], [1], [0, 0, 1, 1], [], []>} : vector<8x4xf32>, vector<4x32xf32>, vector<8x32xf32> -> vector<8x32xf32>
    %24 = arith.addf %20, %23 : vector<8x32xf32>
    %c0_21 = arith.constant 0 : index
    %c0_22 = arith.constant 0 : index
    %25 = vector.load %arg8[%c0_21, %c0_22] : memref<8x32xf32, #tpu.memory_space<vmem>>, vector<8x32xf32>
    %26 = arith.addf %24, %25 : vector<8x32xf32>
    %cst_23 = arith.constant dense<0.000000e+00> : vector<8xf32>
    %27 = vector.multi_reduction <add>, %26, %cst_23 [1] : vector<8x32xf32> to vector<8xf32>
    %28 = vector.shape_cast %27 : vector<8xf32> to vector<8x1xf32>
    %cst_24 = arith.constant 3.200000e+01 : f32
    %29 = vector.broadcast %cst_24 : f32 to vector<8x1xf32>
    %30 = arith.divf %28, %29 : vector<8x1xf32>
    %31 = vector.broadcast %30 : vector<8x1xf32> to vector<8x32xf32>
    %32 = arith.subf %26, %31 : vector<8x32xf32>
    %33 = arith.mulf %32, %32 : vector<8x32xf32>
    %cst_25 = arith.constant dense<0.000000e+00> : vector<8xf32>
    %34 = vector.multi_reduction <add>, %33, %cst_25 [1] : vector<8x32xf32> to vector<8xf32>
    %35 = vector.shape_cast %34 : vector<8xf32> to vector<8x1xf32>
    %cst_26 = arith.constant 3.200000e+01 : f32
    %36 = vector.broadcast %cst_26 : f32 to vector<8x1xf32>
    %37 = arith.divf %35, %36 : vector<8x1xf32>
    %38 = vector.broadcast %30 : vector<8x1xf32> to vector<8x32xf32>
    %39 = arith.subf %26, %38 : vector<8x32xf32>
    %cst_27 = arith.constant 9.99999974E-6 : f32
    %40 = vector.broadcast %cst_27 : f32 to vector<8x1xf32>
    %41 = arith.addf %37, %40 : vector<8x1xf32>
    %42 = math.rsqrt %41 : vector<8x1xf32>
    %43 = vector.broadcast %42 : vector<8x1xf32> to vector<8x32xf32>
    %44 = arith.mulf %39, %43 : vector<8x32xf32>
    %c0_28 = arith.constant 0 : index
    %c0_29 = arith.constant 0 : index
    %45 = vector.load %arg9[%c0_28, %c0_29] : memref<1x32xf32, #tpu.memory_space<vmem>>, vector<1x32xf32>
    %46 = vector.broadcast %45 : vector<1x32xf32> to vector<8x32xf32>
    %47 = arith.mulf %44, %46 : vector<8x32xf32>
    %c0_30 = arith.constant 0 : index
    %c0_31 = arith.constant 0 : index
    %48 = vector.load %arg10[%c0_30, %c0_31] : memref<1x32xf32, #tpu.memory_space<vmem>>, vector<1x32xf32>
    %49 = vector.broadcast %48 : vector<1x32xf32> to vector<8x32xf32>
    %50 = arith.addf %47, %49 : vector<8x32xf32>
    %c0_32 = arith.constant 0 : index
    %c0_33 = arith.constant 0 : index
    %51 = vector.load %arg11[%c0_32, %c0_33] : memref<4x32xf32, #tpu.memory_space<vmem>>, vector<4x32xf32>
    %cst_34 = arith.constant dense<0.000000e+00> : vector<4x8xf32>
    %52 = tpu.matmul %51, %50, %cst_34 {dimension_numbers = #tpu.dot_dimension_numbers<[1], [1], [0], [0], [0, 0, 1, 0], [], []>} : vector<4x32xf32>, vector<8x32xf32>, vector<4x8xf32> -> vector<4x8xf32>
    %c0_35 = arith.constant 0 : index
    %c0_36 = arith.constant 0 : index
    %53 = vector.load %arg12[%c0_35, %c0_36] : memref<4x1xf32, #tpu.memory_space<vmem>>, vector<4x1xf32>
    %54 = vector.broadcast %53 : vector<4x1xf32> to vector<4x8xf32>
    %55 = arith.addf %52, %54 : vector<4x8xf32>
    %56 = math.absf %55 : vector<4x8xf32>
    %cst_37 = arith.constant dense<0.000000e+00> : vector<4xf32>
    %57 = vector.multi_reduction <add>, %56, %cst_37 [1] : vector<4x8xf32> to vector<4xf32>
    %58 = vector.shape_cast %57 : vector<4xf32> to vector<4x1xf32>
    %cst_38 = arith.constant 8.000000e+00 : f32
    %59 = vector.broadcast %cst_38 : f32 to vector<4x1xf32>
    %60 = arith.divf %58, %59 : vector<4x1xf32>
    %61 = arith.divf %11, %60 : vector<4x1xf32>
    %cst_39 = arith.constant dense<0.000000e+00> : vector<4xf32>
    %62 = vector.multi_reduction <add>, %5, %cst_39 [1] : vector<4x16xf32> to vector<4xf32>
    %63 = vector.shape_cast %62 : vector<4xf32> to vector<4x1xf32>
    %cst_40 = arith.constant 1.600000e+01 : f32
    %64 = vector.broadcast %cst_40 : f32 to vector<4x1xf32>
    %65 = arith.divf %63, %64 : vector<4x1xf32>
    %66 = vector.broadcast %65 : vector<4x1xf32> to vector<4x16xf32>
    %67 = arith.subf %5, %66 : vector<4x16xf32>
    %68 = arith.mulf %67, %67 : vector<4x16xf32>
    %cst_41 = arith.constant dense<0.000000e+00> : vector<4xf32>
    %69 = vector.multi_reduction <add>, %68, %cst_41 [1] : vector<4x16xf32> to vector<4xf32>
    %70 = vector.shape_cast %69 : vector<4xf32> to vector<4x1xf32>
    %cst_42 = arith.constant 1.600000e+01 : f32
    %71 = vector.broadcast %cst_42 : f32 to vector<4x1xf32>
    %72 = arith.divf %70, %71 : vector<4x1xf32>
    %cst_43 = arith.constant 9.99999974E-6 : f32
    %73 = vector.broadcast %cst_43 : f32 to vector<4x1xf32>
    %74 = arith.addf %72, %73 : vector<4x1xf32>
    %75 = math.sqrt %74 : vector<4x1xf32>
    %c0_44 = arith.constant 0 : index
    %c0_45 = arith.constant 0 : index
    %76 = vector.load %arg13[%c0_44, %c0_45] : memref<4x1xf32, #tpu.memory_space<vmem>>, vector<4x1xf32>
    %c0_46 = arith.constant 0 : index
    %c0_47 = arith.constant 0 : index
    %77 = vector.load %arg14[%c0_46, %c0_47] : memref<4x1xf32, #tpu.memory_space<vmem>>, vector<4x1xf32>
    %78 = vector.broadcast %65 : vector<4x1xf32> to vector<4x16xf32>
    %79 = arith.subf %5, %78 : vector<4x16xf32>
    %80 = vector.broadcast %75 : vector<4x1xf32> to vector<4x16xf32>
    %81 = arith.divf %79, %80 : vector<4x16xf32>
    %82 = vector.broadcast %76 : vector<4x1xf32> to vector<4x16xf32>
    %83 = arith.mulf %81, %82 : vector<4x16xf32>
    %84 = vector.broadcast %77 : vector<4x1xf32> to vector<4x16xf32>
    %85 = arith.addf %83, %84 : vector<4x16xf32>
    %c0_48 = arith.constant 0 : index
    %c0_49 = arith.constant 0 : index
    %86 = vector.load %arg15[%c0_48, %c0_49] : memref<16x32xf32, #tpu.memory_space<vmem>>, vector<16x32xf32>
    %cst_50 = arith.constant dense<0.000000e+00> : vector<4x32xf32>
    %87 = tpu.matmul %85, %86, %cst_50 {dimension_numbers = #tpu.dot_dimension_numbers<[1], [0], [0], [1], [0, 0, 1, 1], [], []>} : vector<4x16xf32>, vector<16x32xf32>, vector<4x32xf32> -> vector<4x32xf32>
    %c0_51 = arith.constant 0 : index
    %c0_52 = arith.constant 0 : index
    %88 = vector.load %arg16[%c0_51, %c0_52] : memref<1x32xf32, #tpu.memory_space<vmem>>, vector<1x32xf32>
    %89 = vector.broadcast %88 : vector<1x32xf32> to vector<4x32xf32>
    %90 = arith.addf %87, %89 : vector<4x32xf32>
    %cst_53 = arith.constant 0.000000e+00 : f32
    %91 = vector.broadcast %cst_53 : f32 to vector<4x32xf32>
    %92 = arith.maximumf %90, %91 : vector<4x32xf32>
    %c0_54 = arith.constant 0 : index
    %c0_55 = arith.constant 0 : index
    %93 = vector.load %arg17[%c0_54, %c0_55] : memref<32x32xf32, #tpu.memory_space<vmem>>, vector<32x32xf32>
    %cst_56 = arith.constant dense<0.000000e+00> : vector<4x32xf32>
    %94 = tpu.matmul %92, %93, %cst_56 {dimension_numbers = #tpu.dot_dimension_numbers<[1], [0], [0], [1], [0, 0, 1, 1], [], []>} : vector<4x32xf32>, vector<32x32xf32>, vector<4x32xf32> -> vector<4x32xf32>
    %c0_57 = arith.constant 0 : index
    %c0_58 = arith.constant 0 : index
    %95 = vector.load %arg18[%c0_57, %c0_58] : memref<1x32xf32, #tpu.memory_space<vmem>>, vector<1x32xf32>
    %96 = vector.broadcast %95 : vector<1x32xf32> to vector<4x32xf32>
    %97 = arith.addf %94, %96 : vector<4x32xf32>
    %cst_59 = arith.constant 0.000000e+00 : f32
    %98 = vector.broadcast %cst_59 : f32 to vector<4x32xf32>
    %99 = arith.maximumf %97, %98 : vector<4x32xf32>
    %c0_60 = arith.constant 0 : index
    %c0_61 = arith.constant 0 : index
    %100 = vector.load %arg19[%c0_60, %c0_61] : memref<32x8xf32, #tpu.memory_space<vmem>>, vector<32x8xf32>
    %cst_62 = arith.constant dense<0.000000e+00> : vector<4x8xf32>
    %101 = tpu.matmul %99, %100, %cst_62 {dimension_numbers = #tpu.dot_dimension_numbers<[1], [0], [0], [1], [0, 0, 1, 1], [], []>} : vector<4x32xf32>, vector<32x8xf32>, vector<4x8xf32> -> vector<4x8xf32>
    %c0_63 = arith.constant 0 : index
    %c0_64 = arith.constant 0 : index
    %102 = vector.load %arg20[%c0_63, %c0_64] : memref<1x8xf32, #tpu.memory_space<vmem>>, vector<1x8xf32>
    %103 = vector.broadcast %102 : vector<1x8xf32> to vector<4x8xf32>
    %104 = arith.addf %101, %103 : vector<4x8xf32>
    %105 = vector.broadcast %77 : vector<4x1xf32> to vector<4x8xf32>
    %106 = arith.subf %104, %105 : vector<4x8xf32>
    %cst_65 = arith.constant 1.000000e-10 : f32
    %107 = vector.broadcast %cst_65 : f32 to vector<4x1xf32>
    %108 = arith.addf %76, %107 : vector<4x1xf32>
    %109 = vector.broadcast %108 : vector<4x1xf32> to vector<4x8xf32>
    %110 = arith.divf %106, %109 : vector<4x8xf32>
    %111 = vector.broadcast %75 : vector<4x1xf32> to vector<4x8xf32>
    %112 = arith.mulf %110, %111 : vector<4x8xf32>
    %113 = vector.broadcast %65 : vector<4x1xf32> to vector<4x8xf32>
    %114 = arith.addf %112, %113 : vector<4x8xf32>
    %115 = vector.broadcast %61 : vector<4x1xf32> to vector<4x8xf32>
    %116 = arith.mulf %115, %55 : vector<4x8xf32>
    %117 = arith.addf %114, %116 : vector<4x8xf32>
    %c0_66 = arith.constant 0 : index
    %c0_67 = arith.constant 0 : index
    %c0_68 = arith.constant 0 : index
    %118 = vector.load %arg21[%c0_66, %c0_67, %c0_68] : memref<1x4x8xf32, #tpu.memory_space<vmem>>, vector<1x4x8xf32>
    %119 = vector.shape_cast %118 : vector<1x4x8xf32> to vector<4x8xf32>
    %120 = vector.shape_cast %117 : vector<4x8xf32> to vector<1x4x8xf32>
    tpu.vector_store %arg21[%c0_66, %c0_67, %c0_68], %120 {strides = array<i32>} : memref<1x4x8xf32, #tpu.memory_space<vmem>>, vector<1x4x8xf32>,
    return
  }
  func.func @transform_0(%arg0: i32) -> (i32, i32, i32) {
    %c0_i32 = arith.constant 0 : i32
    %c0_i32_0 = arith.constant 0 : i32
    %c0_i32_1 = arith.constant 0 : i32
    return %arg0, %c0_i32, %c0_i32_0 : i32, i32, i32
  }
  func.func @transform_1(%arg0: i32) -> (i32, i32, i32) {
    %c0_i32 = arith.constant 0 : i32
    %c0_i32_0 = arith.constant 0 : i32
    %c0_i32_1 = arith.constant 0 : i32
    return %arg0, %c0_i32, %c0_i32_0 : i32, i32, i32
  }
  func.func @transform_2(%arg0: i32) -> (i32, i32) {
    %c0_i32 = arith.constant 0 : i32
    %c0_i32_0 = arith.constant 0 : i32
    %c0_i32_1 = arith.constant 0 : i32
    return %c0_i32, %c0_i32_0 : i32, i32
  }
  func.func @transform_3(%arg0: i32) -> (i32, i32) {
    %c0_i32 = arith.constant 0 : i32
    %c0_i32_0 = arith.constant 0 : i32
    %c0_i32_1 = arith.constant 0 : i32
    return %c0_i32, %c0_i32_0 : i32, i32
  }
  func.func @transform_4(%arg0: i32) -> (i32, i32) {
    %c0_i32 = arith.constant 0 : i32
    %c0_i32_0 = arith.constant 0 : i32
    %c0_i32_1 = arith.constant 0 : i32
    return %c0_i32, %c0_i32_0 : i32, i32
  }
  func.func @transform_5(%arg0: i32) -> (i32, i32) {
    %c0_i32 = arith.constant 0 : i32
    %c0_i32_0 = arith.constant 0 : i32
    %c0_i32_1 = arith.constant 0 : i32
    return %c0_i32, %c0_i32_0 : i32, i32
  }
  func.func @transform_6(%arg0: i32) -> (i32, i32) {
    %c0_i32 = arith.constant 0 : i32
    %c0_i32_0 = arith.constant 0 : i32
    %c0_i32_1 = arith.constant 0 : i32
    return %c0_i32, %c0_i32_0 : i32, i32
  }
  func.func @transform_7(%arg0: i32) -> (i32, i32) {
    %c0_i32 = arith.constant 0 : i32
    %c0_i32_0 = arith.constant 0 : i32
    %c0_i32_1 = arith.constant 0 : i32
    return %c0_i32, %c0_i32_0 : i32, i32
  }
  func.func @transform_8(%arg0: i32) -> (i32, i32) {
    %c0_i32 = arith.constant 0 : i32
    %c0_i32_0 = arith.constant 0 : i32
    %c0_i32_1 = arith.constant 0 : i32
    return %c0_i32, %c0_i32_0 : i32, i32
  }
  func.func @transform_9(%arg0: i32) -> (i32, i32) {
    %c0_i32 = arith.constant 0 : i32
    %c0_i32_0 = arith.constant 0 : i32
    %c0_i32_1 = arith.constant 0 : i32
    return %c0_i32, %c0_i32_0 : i32, i32
  }
  func.func @transform_10(%arg0: i32) -> (i32, i32) {
    %c0_i32 = arith.constant 0 : i32
    %c0_i32_0 = arith.constant 0 : i32
    %c0_i32_1 = arith.constant 0 : i32
    return %c0_i32, %c0_i32_0 : i32, i32
  }
  func.func @transform_11(%arg0: i32) -> (i32, i32) {
    %c0_i32 = arith.constant 0 : i32
    %c0_i32_0 = arith.constant 0 : i32
    %c0_i32_1 = arith.constant 0 : i32
    return %c0_i32, %c0_i32_0 : i32, i32
  }
  func.func @transform_12(%arg0: i32) -> (i32, i32) {
    %c0_i32 = arith.constant 0 : i32
    %c0_i32_0 = arith.constant 0 : i32
    %c0_i32_1 = arith.constant 0 : i32
    return %c0_i32, %c0_i32_0 : i32, i32
  }
  func.func @transform_13(%arg0: i32) -> (i32, i32) {
    %c0_i32 = arith.constant 0 : i32
    %c0_i32_0 = arith.constant 0 : i32
    %c0_i32_1 = arith.constant 0 : i32
    return %c0_i32, %c0_i32_0 : i32, i32
  }
  func.func @transform_14(%arg0: i32) -> (i32, i32) {
    %c0_i32 = arith.constant 0 : i32
    %c0_i32_0 = arith.constant 0 : i32
    %c0_i32_1 = arith.constant 0 : i32
    return %c0_i32, %c0_i32_0 : i32, i32
  }
  func.func @transform_15(%arg0: i32) -> (i32, i32) {
    %c0_i32 = arith.constant 0 : i32
    %c0_i32_0 = arith.constant 0 : i32
    %c0_i32_1 = arith.constant 0 : i32
    return %c0_i32, %c0_i32_0 : i32, i32
  }
  func.func @transform_16(%arg0: i32) -> (i32, i32) {
    %c0_i32 = arith.constant 0 : i32
    %c0_i32_0 = arith.constant 0 : i32
    %c0_i32_1 = arith.constant 0 : i32
    return %c0_i32, %c0_i32_0 : i32, i32
  }
  func.func @transform_17(%arg0: i32) -> (i32, i32) {
    %c0_i32 = arith.constant 0 : i32
    %c0_i32_0 = arith.constant 0 : i32
    %c0_i32_1 = arith.constant 0 : i32
    return %c0_i32, %c0_i32_0 : i32, i32
  }
  func.func @transform_18(%arg0: i32) -> (i32, i32) {
    %c0_i32 = arith.constant 0 : i32
    %c0_i32_0 = arith.constant 0 : i32
    %c0_i32_1 = arith.constant 0 : i32
    return %c0_i32, %c0_i32_0 : i32, i32
  }
  func.func @transform_19(%arg0: i32) -> (i32, i32) {
    %c0_i32 = arith.constant 0 : i32
    %c0_i32_0 = arith.constant 0 : i32
    %c0_i32_1 = arith.constant 0 : i32
    return %c0_i32, %c0_i32_0 : i32, i32
  }
  func.func @transform_20(%arg0: i32) -> (i32, i32, i32) {
    %c0_i32 = arith.constant 0 : i32
    %c0_i32_0 = arith.constant 0 : i32
    %c0_i32_1 = arith.constant 0 : i32
    return %arg0, %c0_i32, %c0_i32_0 : i32, i32, i32
  }
}

</mosaic_0001>

<bundles_post_ra>
// kernel: _lambda_.1
= control target key start
LH: loop header
LB: loop body
LE: loop exit
PB: predicated region body
PF: predicated region fallthrough
CT: control target
= control target key end

     0   :  { %s2822_s0 = inlined_call_operand.hbm [shape: f32[2,4,16], index: 0, kind: input, shape index: {}]   ;;  %s2823_s1 = inlined_call_operand.vmem [shape: f32[2,16,4], index: 1, kind: input, shape index: {}]   ;;  %s2824_s2 = inlined_call_operand.hbm [shape: f32[16,16], index: 2, kind: input, shape index: {}]   ;;  %s2825_s3 = inlined_call_operand.hbm [shape: f32[24,16], index: 3, kind: input, shape index: {}]   ;;  %s2826_s4 = inlined_call_operand.hbm [shape: f32[4,32], index: 4, kind: input, shape index: {}]   ;;  %s2827_s5 = inlined_call_operand.hbm [shape: f32[4,32], index: 5, kind: input, shape index: {}]   ;;  %s2828_s6 = inlined_call_operand.vmem [shape: f32[4,32], index: 6, kind: input, shape index: {}]   ;;  %s2829_s7 = inlined_call_operand.hbm [shape: f32[8,32], index: 7, kind: input, shape index: {}]   ;;  %s2830_s8 = inlined_call_operand.vmem [shape: f32[1,32], index: 8, kind: input, shape index: {}]   ;;  %s2831_s9 = inlined_call_operand.vmem [shape: f32[1,32], index: 9, kind: input, shape index: {}]   ;;  %s2832_s10 = inlined_call_operand.hbm [shape: f32[4,32], index: 10, kind: input, shape index: {}]   ;;  %s2833_s11 = inlined_call_operand.vmem [shape: f32[4,1], index: 11, kind: input, shape index: {}]   ;;  %s2834_s12 = inlined_call_operand.vmem [shape: f32[4,1], index: 12, kind: input, shape index: {}]   ;;  %s2835_s13 = inlined_call_operand.vmem [shape: f32[4,1], index: 13, kind: input, shape index: {}]   ;;  %s2836_s14 = inlined_call_operand.hbm [shape: f32[16,32], index: 14, kind: input, shape index: {}]   ;;  %s2837_s15 = inlined_call_operand.vmem [shape: f32[1,32], index: 15, kind: input, shape index: {}]   ;;  %s2838_s16 = inlined_call_operand.vmem [shape: f32[32,32], index: 16, kind: input, shape index: {}]   ;;  %s2839_s17 = inlined_call_operand.vmem [shape: f32[1,32], index: 17, kind: input, shape index: {}]   ;;  %s2840_s18 = inlined_call_operand.vmem [shape: f32[32,8], index: 18, kind: input, shape index: {}]   ;;  %s2841_s19 = inlined_call_operand.vmem [shape: f32[1,8], index: 19, kind: input, shape index: {}]   ;;  %s2842_s20 = inlined_call_operand.hbm [shape: f32[2,4,8], index: 20, kind: output, shape index: {}]  }
   0x1   :  { %2851 = sst [smem:[#allocation25_spill]] %s2822_s0 }
   0x2   :  { %2852 = sst [smem:[#allocation26_spill]] %s2823_s1 }
   0x3   :  { %2853 = sst [smem:[#allocation27_spill]] %s2824_s2 }
   0x4   :  { %2854 = sst [smem:[#allocation28_spill]] %s2825_s3 }
   0x5   :  { %2855 = sst [smem:[#allocation29_spill]] %s2826_s4 }
   0x6   :  { %2856 = sst [smem:[#allocation30_spill]] %s2827_s5 }
   0x7   :  { %2857 = sst [smem:[#allocation31_spill]] %s2829_s7 }
   0x8   :  { %2858 = sst [smem:[#allocation32_spill]] %s2832_s10 }
   0x9   :  { %2859 = sst [smem:[#allocation33_spill]] %s2836_s14 }
   0xa   :  { %2860 = sst [smem:[#allocation34_spill]] %s2837_s15 }
   0xb   :  { %2861 = sst [smem:[#allocation35_spill]] %s2839_s17 }
   0xc   :  { %2862 = sst [smem:[#allocation36_spill]] %s2840_s18 }
   0xd   :  { %2863 = sst [smem:[#allocation37_spill]] %s2841_s19 }
   0xe   :  { %2864 = sst [smem:[#allocation38_spill]] %s2842_s20 }
   0xf   :  { %25 = vsyncpa [#allocation3], 0 }
  0x10   :  { %27 = vsyncpa [#allocation3 + $0x1], 0 }
  0x11   :  { %28 = vsyncpa [#allocation6], 0 }
  0x12   :  { %29 = vsyncpa [#allocation9], 0 }
  0x13   :  { %30 = vsyncpa [#allocation12], 0 }
  0x14   :  { %31 = vsyncpa [#allocation15], 0 }
  0x15   :  { %32 = vsyncpa [#allocation4], 0 }
  0x16   :  { %34 = vsyncpa [#allocation4 + $0x1], 0  ;;  %s2452_s1 = smov 0   ;;  %s2454_s22 = smov 0  }
  0x17   :  { %s2456_s23 = smov 0   ;;  %s2458_s24 = smov 0  }
  0x18 LB: > { %2865 = sst [smem:[#allocation23_spill]] %s2327_s23  ;;  %s2333_s2 = smov [#allocation5]   ;;  %s2331_s24 = sphi %s2458_s24, %s2906_s24   ;;  %s2327_s23 = sphi %s2456_s23, %s2903_s23   ;;  %s2323_s22 = sphi %s2454_s22, %s2905_s22   ;;  %s2319_s1 = sphi %s2452_s1, %s2904_s1  }
  0x19   : > { %s513_s25 = sshll.u32 %s2333_s2, 4  ;;  %s2473_s3 = sadd.s32 4294967295, %s2331_s24   ;;  %s514_s25 = int_to_ptr.vmem [resolvable:$true] %s513_s25 }
  0x1a   : > { %p1761_p0 = scmp.ge.s32.totalorder %s2331_s24, 1  ;;  %p2846_p1 = scmp.eq.s32.totalorder %s2473_s3, 0 }
  0x1b   : > { %p501_p2 = scmp.lt.s32.totalorder %s2331_s24, 3  ;;  %s2334_s27 = smov [#allocation8]  }
  0x1c   : > { %s540_s28 = sshll.u32 %s2334_s27, 4  ;;  %s2335_s29 = smov [#allocation11]   ;;  %s541_s28 = int_to_ptr.vmem [resolvable:$true] %s540_s28 }
  0x1d   : > { %p2478_p3 = pnand %p1761_p0, %p501_p2  ;;  %s565_s30 = sshll.u32 %s2335_s29, 4  ;;  %s2491_s30 = int_to_ptr.vmem [resolvable:$true] %s565_s30 }
  0x1e   : > { %s2052_s21 = scalar_lea.vmem %s514_s25, 256  ;;  %p2060_p11 = scmp.lt.s32.totalorder %s514_s25, %s514_s25 }
  0x1f   : > { %s2866_s26 = scalar_select %p2478_p3, 1, 0 }
  0x20   : > { %p1939_p5 = pneg %p2478_p3  ;;  %p2053_p8 = scmp.ne.s32.totalorder %s514_s25, %s2052_s21 }
  0x21   : > { %p2061_p12 = scmp.lt.s32.totalorder %s2052_s21, %s2052_s21 }
  0x22   : > { %p2487_p6 = pnand %p1939_p5, %p2846_p1 }
  0x23   : > { %p2062_p13 = por %p2061_p12, %p2060_p11 }
  0x24   : > { %p2495_p7 = pneg %p2487_p6 }
  0x26   : > { %p2055_p9 = pnand %p2053_p8, %p2495_p7 }
  0x28   : > { %p2056_p10 = pneg %p2055_p9 }
  0x2a   : > { %p2063_p0 = pnand %p2062_p13, %p2056_p10 }
  0x2c   : > { %2066 = shalt.err (!%p2063_p0)
}
  0x2d   : > { %s2336_s2 = smov 128   ;;  %s2337_s27 = smov 8  }
  0x2e   : > { %s2869_s19 = sld [smem:[#allocation27_spill]]  ;;  %s2078_s17 = scalar_lea.vmem %s541_s28, 64 }
  0x2f   : > { %p2079_p2 = scmp.ne.s32.totalorder %s541_s28, %s2078_s17  ;;  %p2086_p9 = scmp.lt.s32.totalorder %s541_s28, %s541_s28 }
  0x30   : > { %p2087_p10 = scmp.lt.s32.totalorder %s2078_s17, %s2078_s17 }
  0x31   : > { %p2081_p5 = pnand %p2079_p2, %p2495_p7 }
  0x32   : > { %p2088_p11 = por %p2087_p10, %p2086_p9 }
  0x33   : > { %p2082_p8 = pneg %p2081_p5 }
  0x34   : > { %1942 = dma.hbm_to_vmem [thread:$0]  (!%p2487_p6), %s2869_s19, 256, %s514_s25, [#allocation6], %s2336_s2, %s2336_s2, %s2337_s27  }
  0x35   : > { %p2089_p12 = pnand %p2088_p11, %p2082_p8 }
  0x37   : > { %2092 = shalt.err (!%p2089_p12)
}
  0x38   : > { %s2870_s15 = sld [smem:[#allocation29_spill]]  ;;  %s2104_s19 = scalar_lea.vmem %s2491_s30, 128 }
  0x39   : > { %p2105_p13 = scmp.ne.s32.totalorder %s2491_s30, %s2104_s19  ;;  %p2112_p5 = scmp.lt.s32.totalorder %s2491_s30, %s2491_s30 }
  0x3a   : > { %p2113_p9 = scmp.lt.s32.totalorder %s2104_s19, %s2104_s19 }
  0x3b   : > { %p2107_p0 = pnand %p2105_p13, %p2495_p7 }
  0x3c   : > { %p2114_p8 = por %p2113_p9, %p2112_p5 }
  0x3d   : > { %p2108_p2 = pneg %p2107_p0 }
  0x3e   : > { %1948 = dma.hbm_to_vmem [thread:$0]  (!%p2487_p6), %s2870_s15, 64, %s541_s28, [#allocation9]  }
  0x3f   : > { %p2115_p10 = pnand %p2114_p8, %p2108_p2 }
  0x41   : > { %2118 = shalt.err (!%p2115_p10)
}
  0x42   : > { %s2871_s7 = sld [smem:[#allocation31_spill]]  ;;  %s2338_s15 = smov [#allocation7]  }
  0x43   : > { %s526_s20 = sshll.u32 %s2338_s15, 4  ;;  %s2339_s25 = smov [#allocation10]   ;;  %s527_s20 = int_to_ptr.vmem [resolvable:$true] %s526_s20 }
  0x44   : > { %s551_s28 = sshll.u32 %s2339_s25, 4  ;;  %s2130_s29 = scalar_lea.vmem %s527_s20, 384  ;;  %s552_s28 = int_to_ptr.vmem [resolvable:$true] %s551_s28 }
  0x45   : > { %p2131_p11 = scmp.ne.s32.totalorder %s527_s20, %s2130_s29  ;;  %p2138_p0 = scmp.lt.s32.totalorder %s527_s20, %s527_s20 }
  0x46   : > { %p2139_p2 = scmp.lt.s32.totalorder %s2130_s29, %s2130_s29 }
  0x47   : > { %p2133_p12 = pnand %p2131_p11, %p2495_p7 }
  0x48   : > { %1954 = dma.hbm_to_vmem [thread:$0]  (!%p2487_p6), %s2871_s7, 128, %s2491_s30, [#allocation12]  }
  0x49   : > { %p2134_p13 = pneg %p2133_p12  ;;  %p2140_p5 = por %p2139_p2, %p2138_p0 }
  0x4b   : > { %p2141_p9 = pnand %p2140_p5, %p2134_p13 }
  0x4d   : > { %2144 = shalt.err (!%p2141_p9)
}
  0x4e   : > { %s2872_s19 = sld [smem:[#allocation28_spill]]  ;;  %s2156_s17 = scalar_lea.vmem %s552_s28, 64 }
  0x4f   : > { %p2157_p8 = scmp.ne.s32.totalorder %s552_s28, %s2156_s17  ;;  %p2164_p12 = scmp.lt.s32.totalorder %s552_s28, %s552_s28 }
  0x50   : > { %p2165_p0 = scmp.lt.s32.totalorder %s2156_s17, %s2156_s17 }
  0x51   : > { %p2159_p10 = pnand %p2157_p8, %p2495_p7 }
  0x52   : > { %p2166_p13 = por %p2165_p0, %p2164_p12 }
  0x53   : > { %p2160_p11 = pneg %p2159_p10 }
  0x54   : > { %1945 = dma.hbm_to_vmem [thread:$0]  (!%p2487_p6), %s2872_s19, 384, %s527_s20, [#allocation6], %s2336_s2, %s2336_s2, %s2337_s27  }
  0x55   : > { %p2167_p2 = pnand %p2166_p13, %p2160_p11 }
  0x57   : > { %2170 = shalt.err (!%p2167_p2)
}
  0x58   : > { %s2873_s5 = sld [smem:[#allocation30_spill]]  ;;  %s2340_s25 = smov [#allocation13]  }
  0x59   : > { %s582_s20 = sshll.u32 %s2340_s25, 4  ;;  %s2341_s29 = smov [#allocation14]   ;;  %s583_s20 = int_to_ptr.vmem [resolvable:$true] %s582_s20 }
  0x5a   : > { %s601_s30 = sshll.u32 %s2341_s29, 4  ;;  %s2182_s21 = scalar_lea.vmem %s583_s20, 64  ;;  %s602_s30 = int_to_ptr.vmem [resolvable:$true] %s601_s30 }
  0x5b   : > { %p2183_p5 = scmp.ne.s32.totalorder %s583_s20, %s2182_s21  ;;  %p2190_p10 = scmp.lt.s32.totalorder %s583_s20, %s583_s20 }
  0x5c   : > { %p2191_p11 = scmp.lt.s32.totalorder %s2182_s21, %s2182_s21 }
  0x5d   : > { %p2185_p9 = pnand %p2183_p5, %p2495_p7 }
  0x5e   : > { %1951 = dma.hbm_to_vmem [thread:$0]  (!%p2487_p6), %s2873_s5, 64, %s552_s28, [#allocation9]  }
  0x5f   : > { %p2186_p8 = pneg %p2185_p9  ;;  %p2192_p12 = por %p2191_p11, %p2190_p10 }
  0x61   : > { %p2193_p0 = pnand %p2192_p12, %p2186_p8 }
  0x63   : > { %2196 = shalt.err (!%p2193_p0)
}
  0x64   : > { %s2874_s10 = sld [smem:[#allocation32_spill]]  ;;  %s2208_s28 = scalar_lea.vmem %s602_s30, 256 }
  0x65   : > { %p2209_p13 = scmp.ne.s32.totalorder %s602_s30, %s2208_s28  ;;  %p2216_p5 = scmp.lt.s32.totalorder %s602_s30, %s602_s30 }
  0x66   : > { %p2217_p9 = scmp.lt.s32.totalorder %s2208_s28, %s2208_s28 }
  0x67   : > { %p2211_p2 = pnand %p2209_p13, %p2495_p7 }
  0x68   : > { %p2218_p1 = por %p2217_p9, %p2216_p5 }
  0x69   : > { %p2212_p4 = pneg %p2211_p2 }
  0x6a   : > { %1957 = dma.hbm_to_vmem [thread:$0]  (!%p2487_p6), %s2874_s10, 64, %s583_s20, [#allocation12]  }
  0x6b   : > { %p2219_p3 = pnand %p2218_p1, %p2212_p4 }
  0x6d   : > { %2222 = shalt.err (!%p2219_p3)
}
  0x6e   : > { %s2875_s14 = sld [smem:[#allocation33_spill]]  ;;  %s1760_s4 = sadd.s32 4294967294, %s2331_s24  }
  0x6f   : > { %s2564_s0 = sadd.s32 1, %s2331_s24   ;;  %s47_s25 = sadd.s32 1, %s2327_s23 }
  0x70   : > { %s44_s20 = ssub.s32 %s2331_s24, %s2564_s0  ;;  %p54_p1 = scmp.ne.s32.totalorder %s2327_s23, %s2323_s22 }
  0x71   : > { %p45_p3 = scmp.eq.s32.totalorder %s44_s20, 0  ;;  %p55_p4 = scmp.eq.s32.totalorder %s2331_s24, 0 }
  0x72   : > { %p60_p7 = scmp.ne.s32.totalorder %s2323_s22, %s2319_s1  ;;  %p488_p8 = scmp.eq.s32.totalorder %s2473_s3, 1 }
  0x73   : > { %s2576_s29 = scalar_select %p45_p3, %s2327_s23, %s47_s25  }
  0x74   : > { %1960 = dma.hbm_to_vmem [thread:$0]  (!%p2487_p6), %s2875_s14, 256, %s602_s30, [#allocation15], %s2336_s2, %s2336_s2, %s2337_s27  }
  0x75   : > { %2876 = sst [smem:[#allocation24_spill]] %s2576_s29  ;;  %p56_p10 = por %p55_p4, %p54_p1 }
  0x76   : > { %p2877_p11 = scmp.eq.s32.totalorder %s2473_s3, 0  ;;  %p2584_p6 = por %p488_p8, %p54_p1 }
  0x77   : > { %p494_p0 = scmp.eq.s32.totalorder %s1760_s4, 1  ;;  %p1976_p13 = scmp.lt.s32.totalorder %s2331_s24, 2 }
  0x78   : > { %p2580_p12 = por %p2877_p11, %p60_p7  ;;  %s630_s27 = sand.u32 1, %s2327_s23  }
  0x79   : > { %s2879_s2 = scalar_select %p2584_p6, 1, 0 }
  0x7a   : > { %s2878_s21 = scalar_select %p2580_p12, 1, 0 }
  0x7b   : > { %p2590_p2 = por %p494_p0, %p60_p7  ;;  %s1770_s19 = sshll.u32 %s630_s27, 2 }
  0x7c   : > { %s1771_s17 = sshll.u32 %s2331_s24, 6  ;;  %s2881_s15 = sld [smem:[#allocation25_spill]] }
  0x7d   : > { %s2880_s30 = scalar_select %p2590_p2, 1, 0 }
  0x7e   : > { %s634_s20 = scalar_lea.vmem [#allocation2], %s1770_s19  ;;  %p2600_p5 = pnand %p1976_p13, %p56_p10 }
  0x7f   : > { %s641_s5 = sshll.u32 %s634_s20, 4  ;;  %s631_s7 = scalar_lea.sflag [#allocation3], %s630_s27  ;;  %s642_s5 = int_to_ptr.vmem [resolvable:$true] %s641_s5 }
  0x80   : > { %p2225_p1 = pneg %p2600_p5 }
  0x82   : > { %s2598_s25 = scalar_lea.hbm %s2881_s15, %s1771_s17  ;;  %s2228_s18 = scalar_lea.hbm %s2881_s15, 128 }
  0x83   : > { %s2223_s10 = scalar_lea.hbm %s2598_s25, 64  ;;  %p2229_p7 = scmp.lt.s32.totalorder %s2598_s25, %s2881_s15 }
  0x84   : > { %p2224_p9 = scmp.ne.s32.totalorder %s2598_s25, %s2223_s10  ;;  %p2230_p8 = scmp.lt.s32.totalorder %s2228_s18, %s2223_s10 }
  0x86   : > { %p2226_p3 = pnand %p2225_p1, %p2224_p9  ;;  %p2231_p10 = por %p2230_p8, %p2229_p7 }
  0x88   : > { %p2227_p4 = pneg %p2226_p3 }
  0x8a   : > { %p2232_p11 = pnand %p2231_p10, %p2227_p4 }
  0x8c   : > { %2235 = shalt.err (!%p2232_p11)
}
  0x8d   : > { %s2236_s20 = scalar_lea.vmem %s642_s5, 64  ;;  %s2342_s27 = smov [#allocation2]  }
  0x8e   : > { %p2237_p0 = scmp.ne.s32.totalorder %s642_s5, %s2236_s20  ;;  %s2241_s29 = sshll.u32 %s2342_s27, 4  ;;  %s2242_s29 = int_to_ptr.vmem [resolvable:$false] %s2241_s29 }
  0x8f   : > { %s2243_s23 = scalar_lea.vmem %s2242_s29, 128  ;;  %p2244_p9 = scmp.lt.s32.totalorder %s642_s5, %s2242_s29 }
  0x90   : > { %p2239_p13 = pnand %p2237_p0, %p2225_p1  ;;  %p2245_p3 = scmp.lt.s32.totalorder %s2243_s23, %s2236_s20 }
  0x92   : > { %p2240_p2 = pneg %p2239_p13  ;;  %p2246_p6 = por %p2245_p3, %p2244_p9 }
  0x94   : > { %p2247_p12 = pnand %p2246_p6, %p2240_p2 }
  0x96   : > { %2250 = shalt.err (!%p2247_p12)
}
  0x97   : > { %1964 = dma.hbm_to_vmem [thread:$0]  (!%p2600_p5), %s2598_s25, 64, %s642_s5, %s631_s7  }
  0x98   : > { %p2883_p4 = scmp.ne.s32.totalorder %s2866_s26, 0 }
  0x99   : > { %s2621_s10 = sand.u32 (!%p2883_p4), 1, %s2323_s22   ;;  %p2884_p6 = scmp.ne.s32.totalorder (!%p2883_p4), %s2878_s21, 0 }
  0x9a   : > { %658 = sbr.rel (%p2883_p4) target bundleno = 1320 (0x528), region = 100  ;;  %s1773_s14 = sshll.u32 (!%p2883_p4), %s2621_s10, 2 }
  0x9b   : > { %s661_s29 = scalar_lea.sflag (!%p2883_p4), [#allocation3], %s2621_s10  ;;  %s664_s23 = scalar_lea.vmem (!%p2883_p4), [#allocation2], %s1773_s14 }
  0x9f   : > { %2294 = dma.done.wait (%p2884_p6), %s661_s29, 64  }
  0xa0   : > { %2296 = vsyncadd (%p2884_p6), %s661_s29, 4294967232  ;;  %p2885_p12 = scmp.eq.s32.totalorder %s2473_s3, 0 }
  0xa2   : > { %2298 = dma.done.wait (%p2885_p12), [#allocation6], 640   ;;  %p2886_p2 = pmov %p2885_p12 }
  0xa4   : > { %2300 = vsyncadd (%p2886_p2), [#allocation6], 4294966656  ;;  %p2887_p5 = pmov %p2886_p2 }
  0xa5   : > { %p2888_p1 = pmov %p2886_p2 }
  0xa6   : > { %2302 = dma.done.wait (%p2887_p5), [#allocation9], 128  }
  0xa7   : > { %2304 = vsyncadd (%p2888_p1), [#allocation9], 4294967168  ;;  %p2889_p7 = pmov %p2888_p1 }
  0xa8   : > { %p2890_p8 = pmov %p2888_p1 }
  0xa9   : > { %2306 = dma.done.wait (%p2889_p7), [#allocation12], 192  }
  0xaa   : > { %2308 = vsyncadd (%p2890_p8), [#allocation12], 4294967104  ;;  %p2891_p10 = pmov %p2888_p1 }
  0xab   : > { %p2892_p11 = pmov %p2888_p1 }
  0xac   : > { %2310 = dma.done.wait (%p2891_p10), [#allocation15], 256  }
  0xad   : > { %2312 = vsyncadd (%p2892_p11), [#allocation15], 4294967040  ;;  %p754_p0 = scmp.lt.s32.totalorder %s2473_s3, 1  ;;  %v2343_v0 = vmov 0.0   ;;  %vm2344_vm0 = vmmov 0   ;;  %s2893_s25 = sld [smem:[#allocation26_spill]] }
  0xae   : > { %1838 = vmatprep.subr.mxu0 %v2343_v0  ;;  %1845 = vmatprep.subr.mxu1 %v2343_v0  ;;  %v763_v1 = vld [vmem:[#allocation5 + $0x8] sm:$0xff]  ;;  %v762_v3 = vld [vmem:[#allocation5] sm:$0xff]  ;;  %v2658_v5 = vld [vmem:[%s664_s23] sm:$0xf]  ;;  %vm764_vm1 = vcmask 130048   ;;  %vm944_vm2 = vcmask 1043456  }
  0xaf   : > { %s755_s5 = scalar_select %p754_p0, %s2473_s3, 1  ;;  %1842 = vmatprep.mubr.msk.f32.mxu0 %vm2344_vm0, %v2343_v0  ;;  %1849 = vmatprep.mubr.msk.f32.mxu1 %vm2344_vm0, %v2343_v0  ;;  %v846_v6 = vld [vmem:[#allocation7] sm:$0xff]  ;;  %v847_v7 = vld [vmem:[#allocation7 + $0x8] sm:$0xff]  ;;  %v848_v8 = vld [vmem:[#allocation7 + $0x10] sm:$0xff]  ;;  %vm840_vm3 = vcmask 125952   ;;  %vm940_vm4 = vcmask 31744  }
  0xb0   : > { %1839 = vmatpush3.msra.mxu0 %v763_v1  ;;  %v939_v9 = vld [vmem:[#allocation10] sm:$0xf]  ;;  %v938_v15 = vld [vmem:[#allocation8] sm:$0xf]  ;;  %v1094_v18 = vld [vmem:[%s2828_s6] sm:$0xf] }
  0xb1   : > { %s1808_s7 = sshll.u32 %s755_s5, 4  ;;  %1840 = vmatprep.subr.mxu0 %v2343_v0  ;;  %v2699_v21 = vld [vmem:[%s2834_s12] sm:$0xf]  ;;  %v2345_v22 = vmov 0   ;;  %v1332_v29 = vld [vmem:[#allocation14 + $0x8] sm:$0xff]  ;;  %v1331_v31 = vld [vmem:[#allocation14] sm:$0xff] }
  0xb2   : > { %1841 = vmatpush3.msra.mxu0 %v762_v3  ;;  %2029 = vset.pattern.permute.xlu1 %v2345_v22  ;;  %v1316_v23 = vld [vmem:[%s2835_s13] sm:$0xf]  ;;  %v1172_v37 = vld [vmem:[#allocation11] sm:$0xff]  ;;  %vm1174_vm5 = vcmask 261120   ;;  %s2894_s18 = sld [smem:[#allocation34_spill]]  ;;  %vm1289_vm8 = vcmask 60416  }
  0xb3   : > { %s758_s4 = scalar_lea.vmem %s2893_s25, %s1808_s7  ;;  %1843 = vmatmul.mubr.msk.f32.vlgmr.msra.gmra.mxu0 %vm764_vm1, %v2658_v5  ;;  %1858 = vmatprep.subr.mxu0 %v2343_v0  ;;  %v1206_v42 = vld [vmem:[%s2833_s11] sm:$0xf]  ;;  %s2895_s21 = sld [smem:[#allocation36_spill]] }
  0xb4   : > { %v761_v2 = vld [vmem:[%s758_s4 + $0x8] sm:$0xff]  ;;  %v760_v4 = vld [vmem:[%s758_s4] sm:$0xff]  ;;  %1860 = vmatprep.mubr.msk.f32.mxu0 %vm2344_vm0, %v2343_v0  ;;  %1859 = vmatpush3.msk.msra.mxu0 %vm944_vm2, %v939_v9  ;;  %s2896_s29 = sld [smem:[#allocation35_spill]]  ;;  %s1805_s26 = sshll.u32 %s2473_s3, 6 }
  0xb5   : > { %1846 = vmatpush3.msra.mxu1 %v761_v2  ;;  %1863 = vmatprep.subr.mxu0 %v2343_v0  ;;  %s2897_s7 = sld [smem:[#allocation37_spill]]  ;;  %s753_s25 = scalar_lea.vmem [#allocation16], %s1773_s14 }
  0xb6   : > { %1847 = vmatprep.subr.mxu1 %v2343_v0  ;;  %2030 = vset.pattern.permute.xlu0 %v2345_v22  ;;  %s1611_s4 = sshll.u32 %s753_s25, 4  ;;  %s1598_s20 = scalar_lea.sflag [#allocation4], %s2621_s10  ;;  %s1612_s4 = int_to_ptr.vmem [resolvable:$true] %s1611_s4 }
  0xb7   : > { %1848 = vmatpush3.msra.mxu1 %v760_v4  ;;  %1321 = vperm.xlu1 %2029, %v2699_v21   ;;  %s2251_s27 = scalar_lea.vmem %s1612_s4, 64  ;;  %p2899_p9 = scmp.ne.s32.totalorder %s2879_s2, 0 }
  0xb8   : > { %1850 = vmatmul.mubr.msk.f32.vlgmr.msra.gmra.mxu1 %vm764_vm1, %v846_v6  ;;  %1873 = vmatprep.subr.mxu1 %v2343_v0  ;;  %v1794_v6 = vld [vmem:[%s2830_s8] ss:$0 sm:$0xff]  ;;  %p2252_p13 = scmp.ne.s32.totalorder %s1612_s4, %s2251_s27  ;;  %s2346_s3 = smov [#allocation16]  }
  0xb9   : > { %1852 = vmatprep.mubr.msk.f32.mxu1 %vm2344_vm0, %v2343_v0  ;;  %v1502_v22 = vld [vmem:[%s2895_s21 + $0x18] sm:$0xff]  ;;  %s2255_s14 = sshll.u32 %s2346_s3, 4  ;;  %s2256_s14 = int_to_ptr.vmem [resolvable:$false] %s2255_s14 }
  0xba   : > { %p2253_p3 = pnand %p2252_p13, %p2899_p9  ;;  %p2258_p6 = scmp.lt.s32.totalorder %s1612_s4, %s2256_s14 }
  0xbb   : > { %1327 = vperm.xlu1 %2029, %v1316_v23   ;;  %v1501_v23 = vld [vmem:[%s2895_s21 + $0x10] sm:$0xff] }
  0xbc   : > { %1853 = vmatmul.mubr.msk.f32.gmra.mxu1 %vm764_vm1, %v847_v7  ;;  %p2254_p4 = pneg %p2253_p3 }
  0xbd   : > { %1855 = vmatprep.mubr.msk.f32.mxu1 %vm2344_vm0, %v2343_v0 }
  0xc0   : > { %1856 = vmatmul.mubr.msk.f32.gmra.mxu1 %vm764_vm1, %v848_v8  ;;  %v1795_v8 = vld [vmem:[%s2831_s9] ss:$0 sm:$0xff] }
  0xc1   : > { %1875 = vmatprep.mubr.msk.f32.mxu1 %vm2344_vm0, %v2343_v0 }
 0x132   : > { %v1322_v54 = vpop.permute.xlu1 %1321 }
 0x136   : > { %v2720_v57 = vpop.permute.xlu1 %1327 }
 0x173   : > { %v834_v10 = vpop.f32.mrf.mxu0 }
 0x174   : > { %v1297_v12 = vsel %vm840_vm3, %v834_v10, 0.0  ;;  %v838_v43 = vsub.f32 %v2658_v5, %v834_v10 }
 0x175   : > { %1298 = vadd.xlane.f32.xlu0 %v1297_v12  ;;  %v1844_v14 = vpop.f32.mrf.mxu0 }
 0x176   : > { %v839_v44 = vand.u32 2147483647, %v838_v43  ;;  %v1798_v14 = vld [vmem:[%s2894_s18] ss:$0 sm:$0xff]  ;;  %s2898_s18 = sld [smem:[#allocation38_spill]] }
 0x178   : > { %v924_v11 = vpop.f32.mrf.mxu1  ;;  %v841_v45 = vsel %vm840_vm3, %v839_v44, 0.0 }
 0x17a   : > { %v1851_v13 = vpop.f32.mrf.mxu1 }
 0x17b   : > { %v1417_v13 = vld [vmem:[%s2838_s16 + $0x18] sm:$0xff] }
 0x17c   : > { %v929_v16 = vpop.f32.mrf.mxu1  ;;  %s1609_s19 = scalar_lea.hbm %s2898_s18, %s1805_s26 }
 0x17d   : > { %1861 = vmatmul.mubr.msk.f32.vlgmr.msra.gmra.mxu0 %vm940_vm4, %v929_v16  ;;  %v1416_v16 = vld [vmem:[%s2838_s16 + $0x10] sm:$0xff] }
 0x17e   : > { %v1854_v17 = vpop.f32.mrf.mxu1  ;;  %1864 = vmatpush3.msk.msra.mxu0 %vm944_vm2, %v938_v15  ;;  %1865 = vmatprep.mubr.msk.f32.mxu0 %vm2344_vm0, %v2343_v0 }
 0x17f   : > { %1868 = vmatprep.subr.mxu0 %v2343_v0 }
 0x180   : > { %v934_v19 = vpop.f32.mrf.mxu1 }
 0x181   : > { %1866 = vmatmul.mubr.msk.f32.vlgmr.msra.gmra.mxu0 %vm940_vm4, %v924_v11  ;;  %v1205_v11 = vld [vmem:[#allocation13] sm:$0xf] }
 0x182   : > { %v1857_v20 = vpop.f32.mrf.mxu1  ;;  %1869 = vmatpush3.msk.msra.mxu0 %vm944_vm2, %v1094_v18  ;;  %1870 = vmatprep.mubr.msk.f32.mxu0 %vm2344_vm0, %v2343_v0  ;;  %v1415_v18 = vld [vmem:[%s2838_s16 + $0x8] sm:$0xff] }
 0x183   : > { %1878 = vmatprep.subr.mxu0 %v2343_v0 }
 0x185   : > { %1871 = vmatmul.mubr.msk.f32.vlgmr.msra.gmra.mxu0 %vm940_vm4, %v934_v19  ;;  %v1414_v19 = vld [vmem:[%s2838_s16] sm:$0xff] }
 0x186   : > { %1882 = vmatprep.mubr.msk.f32.mxu0 %vm2344_vm0, %v2343_v0  ;;  %1879 = vmatpush3.msra.mxu0 %v1332_v29 }
 0x187   : > { %1880 = vmatprep.subr.mxu0 %v2343_v0 }
 0x188   : > { %1881 = vmatpush3.msra.mxu0 %v1331_v31 }
 0x189   : > { %1896 = vmatprep.subr.mxu0 %v2343_v0 }
 0x1fe   : > { %v1299_v24 = vpop.xlane.xlu0 %1298 }
 0x1ff   : > { %v2705_v25 = vmul.f32 0.0625, %v1299_v24  ;;  %v1500_v24 = vld [vmem:[%s2895_s21 + $0x8] sm:$0xff] }
 0x201   : > { %v1301_v26 = vsub.f32 %v834_v10, %v2705_v25 }
 0x203   : > { %v1302_v27 = vmul.f32 %v1301_v26, %v1301_v26 }
 0x205   : > { %v1303_v28 = vsel %vm840_vm3, %v1302_v27, 0.0 }
 0x206   : > { %1304 = vadd.xlane.f32.xlu0 %v1303_v28 }
 0x23d   : > { %v1014_v30 = vpop.f32.mrf.mxu0 }
 0x23f   : > { %v1862_v32 = vpop.f32.mrf.mxu0 }
 0x241   : > { %v1090_v33 = vpop.f32.mrf.mxu0 }
 0x242   : > { %v1091_v35 = vadd.f32 %v1090_v33, %v1014_v30  ;;  %v1800_v33 = vld [vmem:[%s2896_s29] ss:$0 sm:$0xff]  ;;  %s2257_s29 = scalar_lea.vmem %s2256_s14, 128 }
 0x243   : > { %v1867_v34 = vpop.f32.mrf.mxu0  ;;  %p2259_p12 = scmp.lt.s32.totalorder %s2257_s29, %s2251_s27 }
 0x245   : > { %v1167_v36 = vpop.f32.mrf.mxu0  ;;  %p2260_p2 = por %p2259_p12, %p2258_p6 }
 0x246   : > { %v1171_v38 = vadd.f32 %v1167_v36, %v1091_v35 }
 0x247   : > { %v1872_v39 = vpop.f32.mrf.mxu0  ;;  %p2261_p5 = pnand %p2260_p2, %p2254_p4 }
 0x248   : > { %v1173_v40 = vadd.f32 %v1172_v37, %v1171_v38  ;;  %v1584_v37 = vadd.f32 1e-10, %v2699_v21 }
 0x24a   : > { %v1175_v41 = vsel %vm1174_vm5, %v1173_v40, 0.0 }
 0x24b   : > { %1176 = vadd.xlane.f32.xlu0 %v1175_v41  ;;  %v1802_v41 = vld [vmem:[%s2897_s7] ss:$0 sm:$0xff] }
 0x261   : > { %1209 = vperm.xlu0 %2030, %v1206_v42  }
 0x280   : > { %842 = vadd.xlane.f32.xlu0 %v841_v45 }
 0x28f   : > { %v1305_v46 = vpop.xlane.xlu0 %1304 }
 0x290   : > { %v1306_v47 = vmul.f32 0.0625, %v1305_v46 }
 0x292   : > { %v1307_v48 = vadd.f32 1e-05, %v1306_v47 }
 0x294   : > { %2031 = vrsqrt.f32 %v1307_v48  ;;  %vm1310_vm6 = vcmp.eq.f32.partialorder %v1307_v48, inf  ;;  %v1313_v51 = vand.u32 2147483648, %v1307_v48  ;;  %vm1312_vm7 = vcmp.eq.f32.partialorder %v1307_v48, 0.0 }
 0x2a1   : > { %v2032_v49 = vpop.eup %2031 }
 0x2a2   : > { %v1309_v50 = vmul.f32 %v2032_v49, %v1307_v48 }
 0x2a4   : > { %v1311_v52 = vsel %vm1310_vm6, %v1307_v48, %v1309_v50 }
 0x2a5   : > { %v2717_v53 = vsel %vm1312_vm7, %v1313_v51, %v1311_v52 }
 0x2a6   : > { %2033 = vrcp.f32 %v2717_v53 }
 0x2b3   : > { %v2034_v55 = vpop.eup %2033 }
 0x2b4   : > { %v1318_v56 = vmul.f32 %v2034_v55, %v1301_v26  ;;  %v1499_v26 = vld [vmem:[%s2895_s21] sm:$0xff] }
 0x2b6   : > { %v1324_v58 = vmul.f32 %v1322_v54, %v1318_v56 }
 0x2b8   : > { %v1330_v59 = vadd.f32 %v2720_v57, %v1324_v58 }
 0x2ba   : > { %1883 = vmatmul.mubr.msk.f32.vlgmr.msra.gmra.mxu0 %vm764_vm1, %v1330_v59 }
 0x2bb   : > { %1904 = vmatprep.mubr.msk.f32.mxu0 %vm2344_vm0, %v2343_v0  ;;  %1897 = vmatpush3.msra.mxu0 %v1502_v22 }
 0x2bc   : > { %1898 = vmatprep.subr.mxu0 %v2343_v0 }
 0x2bd   : > { %1899 = vmatpush3.msra.mxu0 %v1501_v23 }
 0x2be   : > { %1900 = vmatprep.subr.mxu0 %v2343_v0 }
 0x2bf   : > { %1901 = vmatpush3.msra.mxu0 %v1500_v24 }
 0x2c0   : > { %1902 = vmatprep.subr.mxu0 %v2343_v0 }
 0x2c1   : > { %1903 = vmatpush3.msra.mxu0 %v1499_v26 }
 0x2d4   : > { %v1177_v60 = vpop.xlane.xlu0 %1176 }
 0x2d5   : > { %v1179_v61 = vmul.f32 0.03125, %v1177_v60 }
 0x2d7   : > { %v1180_v62 = vsub.f32 %v1173_v40, %v1179_v61 }
 0x2d9   : > { %v1181_v63 = vmul.f32 %v1180_v62, %v1180_v62 }
 0x2db   : > { %v1182_v1 = vsel %vm1174_vm5, %v1181_v63, 0.0 }
 0x2dc   : > { %1183 = vadd.xlane.f32.xlu1 %v1182_v1  ;;  %v1210_v27 = vpop.permute.xlu0 %1209 }
 0x309   : > { %v843_v42 = vpop.xlane.xlu0 %842 }
 0x30a   : > { %v845_v47 = vmul.f32 0.0625, %v843_v42 }
 0x365   : > { %v1184_v2 = vpop.xlane.xlu1 %1183 }
 0x366   : > { %v1185_v3 = vmul.f32 0.03125, %v1184_v2 }
 0x368   : > { %v1186_v4 = vadd.f32 1e-05, %v1185_v3 }
 0x36a   : > { %2035 = vrsqrt.f32 %v1186_v4 }
 0x377   : > { %v2036_v5 = vpop.eup %2035 }
 0x378   : > { %v1188_v7 = vmul.f32 %v2036_v5, %v1180_v62 }
 0x37a   : > { %v1196_v9 = vmul.f32 %v1794_v6, %v1188_v7  ;;  %v1409_v12 = vpop.f32.mrf.mxu0 }
 0x37b   : > { %v1410_v17 = vadd.f32 %v1798_v14, %v1409_v12 }
 0x37c   : > { %v1204_v10 = vadd.f32 %v1795_v8, %v1196_v9  ;;  %v1884_v15 = vpop.f32.mrf.mxu0 }
 0x37d   : > { %v1413_v20 = vmax.f32 %v1410_v17, 0.0 }
 0x37e   : > { %1874 = vmatpush3.xpose.msk.msra.mxu1 %vm1174_vm5, %v1204_v10 }
 0x37f   : > { %1885 = vmatprep.subr.mxu1 %v2343_v0 }
 0x381   : > { %1876 = vmatmul.mubr.msk.f32.vlgmr.msra.gmra.mxu1 %vm1174_vm5, %v1205_v11 }
 0x382   : > { %1886 = vmatpush3.msra.mxu1 %v1417_v13  ;;  %1893 = vmatprep.mubr.msk.f32.mxu1 %vm2344_vm0, %v2343_v0 }
 0x383   : > { %1887 = vmatprep.subr.mxu1 %v2343_v0 }
 0x384   : > { %1888 = vmatpush3.msra.mxu1 %v1416_v16 }
 0x385   : > { %1889 = vmatprep.subr.mxu1 %v2343_v0 }
 0x386   : > { %1890 = vmatpush3.msra.mxu1 %v1415_v18 }
 0x387   : > { %1891 = vmatprep.subr.mxu1 %v2343_v0 }
 0x388   : > { %1892 = vmatpush3.msra.mxu1 %v1414_v19 }
 0x389   : > { %1894 = vmatmul.mubr.msk.f32.vlgmr.msra.gmra.mxu1 %vm1174_vm5, %v1413_v20 }
 0x441   : > { %v1284_v28 = vpop.f32.mrf.mxu1 }
 0x442   : > { %v1285_v29 = vadd.f32 %v1284_v28, %v1210_v27 }
 0x443   : > { %v1877_v30 = vpop.f32.mrf.mxu1 }
 0x444   : > { %v1288_v31 = vand.u32 2147483647, %v1285_v29 }
 0x446   : > { %v1290_v32 = vsel %vm1289_vm8, %v1288_v31, 0.0 }
 0x447   : > { %1291 = vadd.xlane.f32.xlu1 %v1290_v32 }
 0x449   : > { %v1494_v34 = vpop.f32.mrf.mxu1 }
 0x44a   : > { %v1495_v0 = vadd.f32 %v1800_v33, %v1494_v34 }
 0x44b   : > { %v1895_v35 = vpop.f32.mrf.mxu1 }
 0x44c   : > { %v1498_v36 = vmax.f32 %v1495_v0, 0.0 }
 0x44e   : > { %1905 = vmatmul.mubr.msk.f32.vlgmr.msra.gmra.mxu0 %vm1174_vm5, %v1498_v36 }
 0x458   : > { %1587 = vperm.xlu1 %2029, %v1584_v37  }
 0x4d0   : > { %v1292_v38 = vpop.xlane.xlu1 %1291 }
 0x4d1   : > { %v1294_v39 = vmul.f32 0.125, %v1292_v38 }
 0x4d3   : > { %2037 = vrcp.f32 %v1294_v39 }
 0x4d4   : > { %v1588_v40 = vpop.permute.xlu1 %1587 }
 0x4d5   : > { %2039 = vrcp.f32 %v1588_v40 }
 0x4e0   : > { %v2038_v45 = vpop.eup %2037 }
 0x4e1   : > { %v1296_v49 = vmul.f32 %v2038_v45, %v845_v47 }
 0x4e2   : > { %v2040_v48 = vpop.eup %2039 }
 0x4e3   : > { %v1594_v54 = vmul.f32 %v1296_v49, %v1285_v29 }
 0x50e   : > { %v1579_v43 = vpop.f32.mrf.mxu0 }
 0x50f   : > { %v1580_v44 = vadd.f32 %v1802_v41, %v1579_v43 }
 0x510   : > { %v1906_v46 = vpop.f32.mrf.mxu0 }
 0x511   : > { %v1583_v21 = vsub.f32 %v1580_v44, %v2720_v57 }
 0x513   : > { %v1591_v50 = vmul.f32 %v2040_v48, %v1583_v21 }
 0x515   : > { %v1592_v51 = vmul.f32 %v1591_v50, %v2717_v53 }
 0x517   : > { %v1593_v52 = vadd.f32 %v1592_v51, %v2705_v25 }
 0x519   : > { %v1595_v55 = vadd.f32 %v1594_v54, %v1593_v52 }
 0x51b   : > { %1596 = vst.msk [vmem:[%s753_s25] sm:$0xf] %vm1289_vm8, %v1595_v55 }
 0x51c   : > { %2264 = shalt.err (!%p2261_p5)
}
 0x51d   : > { %s2265_s23 = scalar_lea.hbm %s1609_s19, 64  ;;  %s2269_s7 = scalar_lea.hbm %s2898_s18, 128 }
 0x51e   : > { %p2266_p1 = scmp.ne.s32.totalorder %s1609_s19, %s2265_s23  ;;  %p2270_p10 = scmp.lt.s32.totalorder %s1609_s19, %s2898_s18 }
 0x51f   : > { %p2271_p11 = scmp.lt.s32.totalorder %s2269_s7, %s2265_s23 }
 0x520   : > { %p2267_p7 = pnand %p2266_p1, %p2899_p9 }
 0x521   : > { %p2272_p0 = por %p2271_p11, %p2270_p10 }
 0x522   : > { %p2268_p8 = pneg %p2267_p7 }
 0x524   : > { %p2273_p13 = pnand %p2272_p0, %p2268_p8 }
 0x526   : > { %2276 = shalt.err (!%p2273_p13)
}
 0x527   : > { %1937 = dma.vmem_to_hbm [thread:$0]  (%p2899_p9), %s1612_s4, 64, %s1609_s19, %s1598_s20  }
 0x528 PF: > { %s1623_s17 = sand.u32 1, %s2319_s1   ;;  %p2900_p3 = scmp.ne.s32.totalorder %s2880_s30, 0 }
 0x529   : > { %p2901_p4 = scmp.ge.s32.totalorder %s2331_s24, 2  ;;  %s1624_s28 = scalar_lea.sflag [#allocation4], %s1623_s17 }
 0x52b   : > { %p1966_p6 = pnand %p2901_p4, %p2900_p3 }
 0x52d   : > { %p1967_p12 = pneg %p1966_p6 }
 0x52f   : > { %2314 = dma.done.wait (%p1967_p12), %s1624_s28, 64  }
 0x530   : > { %2316 = vsyncadd (%p1967_p12), %s1624_s28, 4294967232  ;;  %s2902_s27 = sld [smem:[#allocation23_spill]]  ;;  %p37_p2 = scmp.ge.s32.totalorder %s2564_s0, 4  }
 0x531   : > { %s2903_s23 = sld [smem:[#allocation24_spill]]  ;;  %s2904_s1 = smov %s2323_s22 }
 0x532   : > { %s2906_s24 = smov %s2564_s0  ;;  %39 = sbr.rel (!%p37_p2) target bundleno = 24 (0x18), region = 176 }
 0x536   : > { %s2905_s22 = smov %s2902_s27 }
 0x537   :  { %1629 = vsyncpa [#allocation3], 1 }
 0x538   :  { %1631 = vsyncpa [#allocation3 + $0x1], 1 }
 0x539   :  { %1632 = vsyncpa [#allocation6], 1 }
 0x53a   :  { %1633 = vsyncpa [#allocation9], 1 }
 0x53b   :  { %1634 = vsyncpa [#allocation12], 1 }
 0x53c   :  { %1635 = vsyncpa [#allocation15], 1 }
 0x53d   :  { %1636 = vsyncpa [#allocation4], 1 }
 0x53e   :  { %1638 = vsyncpa [#allocation4 + $0x1], 1 }

</bundles_post_ra>
